<compile_context>
chip_gen: v7x
topology: tpu7x:2x2x1
jax: 0.10.0
libtpu: 0.0.40
codegen_flags: <defaults>
</compile_context>

<pallas_src>
import functools

import jax
import jax.numpy as jnp
from jax import lax
from jax.experimental import pallas as pl
from jax.experimental.pallas import tpu as pltpu

CP = 128            # lane-padded channel width for all activations / outputs
TM = 1024           # GEMM row-tile (fits v5e 16MiB scoped, v6e, v7x 64MiB VMEM)
VMEM_LIMIT = 32 * 1024 * 1024


def _round_up(x, m):
    return (x + m - 1) // m * m


# ----------------------------------------------------------------------------
# Pallas kernels
# ----------------------------------------------------------------------------

def _gemm_bn_kernel(x_ref, w_ref, s_ref, b_ref, o_ref, *, relu):
    acc = jnp.dot(x_ref[...], w_ref[...], preferred_element_type=jnp.float32)
    acc = acc * s_ref[...] + b_ref[...]
    if relu:
        acc = jnp.maximum(acc, 0.0)
    o_ref[...] = acc.astype(o_ref.dtype)


def _gemm_bn_res_kernel(x_ref, w_ref, s_ref, b_ref, r_ref, o_ref, *, relu):
    acc = jnp.dot(x_ref[...], w_ref[...], preferred_element_type=jnp.float32)
    acc = acc * s_ref[...] + b_ref[...] + r_ref[...].astype(jnp.float32)
    if relu:
        acc = jnp.maximum(acc, 0.0)
    o_ref[...] = acc.astype(o_ref.dtype)


def fused_gemm_bn(patches, wmat, scale, bias, residual=None, relu=True):
    """(M,K)bf16 @ (K,128)bf16 * scale + bias (+res) (+ReLU) -> (M,128) bf16.

    Tiled over M (pipelined, megacore-parallel); weights/scale/bias are small
    and stay whole-block resident.
    """
    M, K = patches.shape
    tm = min(TM, _round_up(M, 128))
    Mp = _round_up(M, tm)

    x = patches
    if Mp != M:
        x = jnp.pad(x, ((0, Mp - M), (0, 0)))

    args = [x, wmat, scale, bias]
    in_specs = [
        pl.BlockSpec((tm, K), lambda i: (i, 0)),
        pl.BlockSpec((K, CP), lambda i: (0, 0)),
        pl.BlockSpec((1, CP), lambda i: (0, 0)),
        pl.BlockSpec((1, CP), lambda i: (0, 0)),
    ]
    if residual is not None:
        r = residual
        if Mp != M:
            r = jnp.pad(r, ((0, Mp - M), (0, 0)))
        args.append(r)
        in_specs.append(pl.BlockSpec((tm, CP), lambda i: (i, 0)))
        kernel = functools.partial(_gemm_bn_res_kernel, relu=relu)
    else:
        kernel = functools.partial(_gemm_bn_kernel, relu=relu)

    out = pl.pallas_call(
        kernel,
        out_shape=jax.ShapeDtypeStruct((Mp, CP), jnp.bfloat16),
        grid=(Mp // tm,),
        in_specs=in_specs,
        out_specs=pl.BlockSpec((tm, CP), lambda i: (i, 0)),
        compiler_params=pltpu.CompilerParams(
            dimension_semantics=("parallel",),
            vmem_limit_bytes=VMEM_LIMIT,
        ),
    )(*args)
    if Mp != M:
        out = out[:M]
    return out


def _tail_kernel(f_ref, w_ref, b_ref, logit_ref, att_ref, *, hw):
    """Fused global-avg-pool + linear head + self-attention normalization."""
    f = f_ref[...].astype(jnp.float32)                       # (N, HW, 128)
    # head: pooled features (padded channels are zero; padded weight rows too)
    pooled = jnp.mean(f, axis=1)                             # (N, 128)
    logit_ref[...] = (jnp.dot(pooled, w_ref[...],
                              preferred_element_type=jnp.float32) + b_ref[...])
    # self-attention map: channel sum, per-sample (mean, unbiased std) norm
    s = jnp.sum(f, axis=2)                                   # (N, HW)
    mean = jnp.mean(s, axis=1, keepdims=True)
    d = s - mean
    var = jnp.sum(d * d, axis=1, keepdims=True) / (hw - 1)   # torch.std unbiased
    att_ref[...] = d * lax.rsqrt(var + 1e-12)                # eps for var==0


def head_and_attention(feat, w, b, num_classes):
    """feat: (N,H,W,128) bf16 -> (logits (N,num_classes) f32, att (N,H*W) f32)."""
    N, H, W, C = feat.shape
    hw = H * W
    f = feat.reshape(N, hw, C)
    logits, att = pl.pallas_call(
        functools.partial(_tail_kernel, hw=hw),
        out_shape=(jax.ShapeDtypeStruct((N, CP), jnp.float32),
                   jax.ShapeDtypeStruct((N, hw), jnp.float32)),
        grid=(1,),
        in_specs=[pl.BlockSpec((N, hw, C), lambda i: (0, 0, 0)),
                  pl.BlockSpec((C, CP), lambda i: (0, 0)),
                  pl.BlockSpec((1, CP), lambda i: (0, 0))],
        out_specs=(pl.BlockSpec((N, CP), lambda i: (0, 0)),
                   pl.BlockSpec((N, hw), lambda i: (0, 0))),
        compiler_params=pltpu.CompilerParams(
            dimension_semantics=("arbitrary",),
            vmem_limit_bytes=VMEM_LIMIT,
        ),
    )(f, w, b)
    return logits[:, :num_classes], att


# ----------------------------------------------------------------------------
# Conv3x3 (+BN +ReLU +residual) built on the fused, tiled GEMM kernel
# ----------------------------------------------------------------------------

def conv3x3_bn(x, conv, stride=1, residual=None, relu=True):
    """x: (N,H,W,>=cin) bf16 (channels >= cin are ignored).
    Returns (N,Ho,Wo,128) bf16 with channels >= cout exactly zero."""
    N, H, W, _ = x.shape
    cin = conv["cin"]
    Ho = (H - 1) // stride + 1
    Wo = (W - 1) // stride + 1
    xp = jnp.pad(x[..., :cin], ((0, 0), (1, 1), (1, 1), (0, 0)))
    cols = []
    for kh in range(3):
        for kw in range(3):
            cols.append(xp[:, kh:kh + (Ho - 1) * stride + 1:stride,
                              kw:kw + (Wo - 1) * stride + 1:stride, :])
    patches = jnp.stack(cols, axis=3).reshape(N * Ho * Wo, 9 * cin)
    res = None if residual is None else residual.reshape(N * Ho * Wo, CP)
    out = fused_gemm_bn(patches, conv["wmat"], conv["scale"], conv["bias"],
                        residual=res, relu=relu)
    return out.reshape(N, Ho, Wo, CP)


def basic_block_fwd(x, p, stride):
    """Standard CIFAR BasicBlock with option-A zero-pad shortcut."""
    cin = p["conv1"]["cin"]
    planes = p["conv1"]["cout"]
    out = conv3x3_bn(x, p["conv1"], stride=stride, relu=True)
    if stride != 1 or cin != planes:
        sc = x[:, ::stride, ::stride, :cin]
        pad = planes // 4
        sc = jnp.pad(sc, ((0, 0), (0, 0), (0, 0), (pad, CP - cin - pad)))
    else:
        sc = x                      # already 128-padded with zeros beyond cin
    out = conv3x3_bn(out, p["conv2"], stride=1, residual=sc, relu=True)
    return out


def run_layer(x, layer_params):
    for p, s in layer_params:
        x = basic_block_fwd(x, p, s)
    return x


# ----------------------------------------------------------------------------
# Deterministic parameter initialization (mirrors the PyTorch __init__ shapes)
# ----------------------------------------------------------------------------

def kaiming_conv(key, cin, cout):
    std = (2.0 / (cin * 9)) ** 0.5
    return (jax.random.normal(key, (3, 3, cin, cout)) * std).astype(jnp.float32)


def bn_params(key, c, eps=1e-5):
    k1, k2, k3, k4 = jax.random.split(key, 4)
    gamma = 1.0 + 0.1 * jax.random.normal(k1, (c,))
    beta = 0.1 * jax.random.normal(k2, (c,))
    rmean = 0.1 * jax.random.normal(k3, (c,))
    rvar = 1.0 + 0.1 * jnp.abs(jax.random.normal(k4, (c,)))
    scale = gamma / jnp.sqrt(rvar + eps)
    bias = beta - rmean * scale
    return scale.astype(jnp.float32), bias.astype(jnp.float32)


def prep_conv(w, scale, bias):
    """GEMM-ready weights: (9*cin, 128) bf16 wmat, (1,128) f32 scale/bias."""
    kh, kw, cin, cout = w.shape
    wmat = w.reshape(kh * kw * cin, cout)
    wmat = jnp.pad(wmat, ((0, 0), (0, CP - cout))).astype(jnp.bfloat16)
    s = jnp.pad(scale, (0, CP - cout)).reshape(1, CP).astype(jnp.float32)
    b = jnp.pad(bias, (0, CP - cout)).reshape(1, CP).astype(jnp.float32)
    return dict(wmat=wmat, scale=s, bias=b, cin=cin, cout=cout)


def make_block_params(key, cin, planes):
    k1, k2, k3, k4 = jax.random.split(key, 4)
    conv1 = prep_conv(kaiming_conv(k1, cin, planes), *bn_params(k2, planes))
    conv2 = prep_conv(kaiming_conv(k3, planes, planes), *bn_params(k4, planes))
    return dict(conv1=conv1, conv2=conv2)


def make_layer_params(key, cin, planes, num_blocks, stride):
    keys = jax.random.split(key, num_blocks)
    strides = [stride] + [1] * (num_blocks - 1)
    params, cur = [], cin
    for k, s in zip(keys, strides):
        params.append((make_block_params(k, cur, planes), s))
        cur = planes
    return params, cur


def make_linear(key, cin, cout):
    k1, k2 = jax.random.split(key)
    w = jax.random.normal(k1, (cin, cout)) * (2.0 / cin) ** 0.5   # kaiming_normal_
    bound = 1.0 / cin ** 0.5
    b = jax.random.uniform(k2, (cout,), minval=-bound, maxval=bound)
    # pad to 128x128 / (1,128) so the head GEMM output is lane-dense
    wp = jnp.pad(w, ((0, CP - cin), (0, CP - cout))).astype(jnp.float32)
    bp = jnp.pad(b, (0, CP - cout)).reshape(1, CP).astype(jnp.float32)
    return wp, bp


def init_params(key, num_blocks=(1, 1, 1), num_classes=10):
    keys = jax.random.split(key, 10)
    params = {"num_classes": num_classes}
    params["conv1"] = prep_conv(kaiming_conv(keys[0], 3, 16),
                                *bn_params(keys[1], 16))
    l1, c = make_layer_params(keys[2], 16, 16, num_blocks[0], 1)
    l2, c = make_layer_params(keys[3], c, 32, num_blocks[1], 2)
    l3, c = make_layer_params(keys[4], c, 64, num_blocks[2], 2)
    a2, c2 = make_layer_params(keys[5], 16, 32, num_blocks[1], 2)
    a3, c2 = make_layer_params(keys[6], c2, 64, num_blocks[2], 2)
    params["layer1"], params["layer2"], params["layer3"] = l1, l2, l3
    params["aux_layer2"], params["aux_layer3"] = a2, a3
    params["linear"] = make_linear(keys[7], 64, num_classes)
    params["aux_linear_1"] = make_linear(keys[8], 64, num_classes)
    params["aux_linear_2"] = make_linear(keys[9], 64, num_classes)
    return params


# ----------------------------------------------------------------------------
# Losses (small glue, plain JAX) and forward pass
# ----------------------------------------------------------------------------

def kl_loss(teacher, student, T=1.0):
    # nn.KLDivLoss() default reduction='mean' = element-wise mean over N*C.
    # log-softmax form avoids 0 * (-inf) NaNs when q underflows.
    log_p = jax.nn.log_softmax(student / T, axis=1)
    log_q = jax.nn.log_softmax(teacher / T, axis=1)
    q = jnp.exp(log_q)
    kl = q * (log_q - log_p)
    return jnp.mean(kl) * (T * T)


def forward(params, x_nchw, KL_w=50.0):
    x = jnp.transpose(x_nchw, (0, 2, 3, 1)).astype(jnp.bfloat16)  # NCHW -> NHWC

    out = conv3x3_bn(x, params["conv1"], stride=1, relu=True)
    out = run_layer(out, params["layer1"])
    aux_out = out
    out = run_layer(out, params["layer2"])
    aux_out_2 = out
    out = run_layer(out, params["layer3"])

    # dropout(p=0.2) -> identity in inference mode
    aux_out_1 = run_layer(aux_out, params["aux_layer2"])
    aux_out_1 = run_layer(aux_out_1, params["aux_layer3"])
    aux_out_2 = run_layer(aux_out_2, params["aux_layer3"])

    nc = params["num_classes"]
    logits0, s0 = head_and_attention(out, *params["linear"], nc)
    logits1, s1 = head_and_attention(aux_out_1, *params["aux_linear_1"], nc)
    logits2, s2 = head_and_attention(aux_out_2, *params["aux_linear_2"], nc)
    output = [logits0, logits1, logits2]

    layer3_student = s0
    layer3_teacher = (s0 + s1 + s2) / 3.0
    att_loss = jnp.mean((layer3_student - layer3_teacher) ** 2)   # MSELoss

    out_et = (logits0 + logits1 + logits2) / 3.0
    kd_loss = KL_w * kl_loss(out_et, logits0, T=3.0) + att_loss
    return output, kd_loss


# ----------------------------------------------------------------------------

if __name__ == "__main__":
    key = jax.random.PRNGKey(0)
    x = jax.random.normal(key, (2, 3, 16, 16), jnp.float32)   # small NCHW input
    params = init_params(jax.random.PRNGKey(42), num_blocks=(1, 1, 1),
                         num_classes=10)
    output, kd_loss = forward(params, x, KL_w=50.0)
    jax.block_until_ready((output, kd_loss))
    assert output[0].shape == (2, 10) and output[1].shape == (2, 10) \
        and output[2].shape == (2, 10) and kd_loss.shape == ()
    assert bool(jnp.isfinite(kd_loss))
    print("KERNEL_OK")
</pallas_src>

<mosaic_0001>
module attributes {stable_mosaic.version = 11 : i64} {
  func.func @_gemm_bn_kernel(%arg0: i32, %arg1: memref<512x27xbf16, #tpu.memory_space<vmem>>, %arg2: memref<27x128xbf16, #tpu.memory_space<vmem>>, %arg3: memref<1x128xf32, #tpu.memory_space<vmem>>, %arg4: memref<1x128xf32, #tpu.memory_space<vmem>>, %arg5: memref<512x128xbf16, #tpu.memory_space<vmem>>) attributes {dimension_semantics = [#tpu.dimension_semantics<parallel>], iteration_bounds = array<i64: 1>, scalar_prefetch = 0 : i64, scratch_operands = 0 : i64, tpu.core_type = #tpu.core_type<tc>, window_params = [{transform_indices = @transform_0, window_bounds = array<i64: 512, 27>}, {pipeline_mode = #tpu.pipeline_mode<synchronous>, transform_indices = @transform_1, window_bounds = array<i64: 27, 128>}, {pipeline_mode = #tpu.pipeline_mode<synchronous>, transform_indices = @transform_2, window_bounds = array<i64: 1, 128>}, {pipeline_mode = #tpu.pipeline_mode<synchronous>, transform_indices = @transform_3, window_bounds = array<i64: 1, 128>}, {transform_indices = @transform_4, window_bounds = array<i64: 512, 128>}]} {
    %c0 = arith.constant 0 : index
    %c0_0 = arith.constant 0 : index
    %0 = vector.load %arg1[%c0, %c0_0] : memref<512x27xbf16, #tpu.memory_space<vmem>>, vector<512x27xbf16>
    %c0_1 = arith.constant 0 : index
    %c0_2 = arith.constant 0 : index
    %1 = vector.load %arg2[%c0_1, %c0_2] : memref<27x128xbf16, #tpu.memory_space<vmem>>, vector<27x128xbf16>
    %cst = arith.constant dense<0.000000e+00> : vector<512x128xf32>
    %2 = tpu.matmul %0, %1, %cst {dimension_numbers = #tpu.dot_dimension_numbers<[1], [0], [0], [1], [0, 0, 1, 1], [], []>} : vector<512x27xbf16>, vector<27x128xbf16>, vector<512x128xf32> -> vector<512x128xf32>
    %c0_3 = arith.constant 0 : index
    %c0_4 = arith.constant 0 : index
    %3 = vector.load %arg3[%c0_3, %c0_4] : memref<1x128xf32, #tpu.memory_space<vmem>>, vector<1x128xf32>
    %4 = vector.broadcast %3 : vector<1x128xf32> to vector<512x128xf32>
    %5 = arith.mulf %2, %4 : vector<512x128xf32>
    %c0_5 = arith.constant 0 : index
    %c0_6 = arith.constant 0 : index
    %6 = vector.load %arg4[%c0_5, %c0_6] : memref<1x128xf32, #tpu.memory_space<vmem>>, vector<1x128xf32>
    %7 = vector.broadcast %6 : vector<1x128xf32> to vector<512x128xf32>
    %8 = arith.addf %5, %7 : vector<512x128xf32>
    %cst_7 = arith.constant 0.000000e+00 : f32
    %9 = vector.broadcast %cst_7 : f32 to vector<512x128xf32>
    %10 = arith.maximumf %8, %9 : vector<512x128xf32>
    %11 = arith.truncf %10 : vector<512x128xf32> to vector<512x128xbf16>
    %c0_8 = arith.constant 0 : index
    %c0_9 = arith.constant 0 : index
    %12 = vector.load %arg5[%c0_8, %c0_9] : memref<512x128xbf16, #tpu.memory_space<vmem>>, vector<512x128xbf16>
    tpu.vector_store %arg5[%c0_8, %c0_9], %11 {strides = array<i32>} : memref<512x128xbf16, #tpu.memory_space<vmem>>, vector<512x128xbf16>,
    return
  }
  func.func @transform_0(%arg0: i32) -> (i32, i32) {
    %c0_i32 = arith.constant 0 : i32
    %c0_i32_0 = arith.constant 0 : i32
    return %arg0, %c0_i32 : i32, i32
  }
  func.func @transform_1(%arg0: i32) -> (i32, i32) {
    %c0_i32 = arith.constant 0 : i32
    %c0_i32_0 = arith.constant 0 : i32
    %c0_i32_1 = arith.constant 0 : i32
    return %c0_i32, %c0_i32_0 : i32, i32
  }
  func.func @transform_2(%arg0: i32) -> (i32, i32) {
    %c0_i32 = arith.constant 0 : i32
    %c0_i32_0 = arith.constant 0 : i32
    %c0_i32_1 = arith.constant 0 : i32
    return %c0_i32, %c0_i32_0 : i32, i32
  }
  func.func @transform_3(%arg0: i32) -> (i32, i32) {
    %c0_i32 = arith.constant 0 : i32
    %c0_i32_0 = arith.constant 0 : i32
    %c0_i32_1 = arith.constant 0 : i32
    return %c0_i32, %c0_i32_0 : i32, i32
  }
  func.func @transform_4(%arg0: i32) -> (i32, i32) {
    %c0_i32 = arith.constant 0 : i32
    %c0_i32_0 = arith.constant 0 : i32
    return %arg0, %c0_i32 : i32, i32
  }
}

</mosaic_0001>

<bundles_post_ra>
// kernel: tpu_custom_call.1
= control target key start
LH: loop header
LB: loop body
LE: loop exit
PB: predicated region body
PF: predicated region fallthrough
CT: control target
= control target key end

     0   :  { %vm355_vm0 = vcmask 1044480   ;;  %vm356_vm1 = vcmask 1045504   ;;  %v1748_v2 = vmov 65535   ;;  %vm258_vm2 = vcmask 220160   ;;  %s2061_s0 = inlined_call_operand.vmem [shape: bf16[512,27], index: 0, kind: input, shape index: {}]   ;;  %s2062_s1 = inlined_call_operand.vmem [shape: bf16[27,128], index: 1, kind: input, shape index: {}]   ;;  %s2063_s2 = inlined_call_operand.vmem [shape: f32[1,128], index: 2, kind: input, shape index: {}]   ;;  %s2064_s3 = inlined_call_operand.vmem [shape: f32[1,128], index: 3, kind: input, shape index: {}]   ;;  %s2065_s4 = inlined_call_operand.hbm [shape: bf16[512,128], index: 4, kind: output, shape index: {}]  }
   0x1   :  { %v1690_v0 = vld [vmem:[%s2062_s1] sm:$0xff]   ;;  %v1691_v1 = vld [vmem:[%s2062_s1 + $0x8] sm:$0x3f]   ;;  %v357_v3 = vsel %vm355_vm0, 4294967295, %v1748_v2  ;;  %v1696_v10 = vld [vmem:[%s2061_s0 + $0x10] sm:$0xff]  }
   0x2   :  { %1614 = vmatprep.subr.bf16.mxu0 %v1690_v0  ;;  %1682 = vmatprep.subr.bf16.mxu1 %v1690_v0  ;;  %v1692_v4 = vld [vmem:[%s2061_s0] sm:$0xff]   ;;  %v358_v6 = vsel %vm356_vm1, %v357_v3, 0  ;;  %v1694_v8 = vld [vmem:[%s2061_s0 + $0x8] sm:$0xff]   ;;  %v1697_v11 = vld [vmem:[%s2061_s0 + $0x90] sm:$0xff]  }
   0x3   :  { %1615 = vmatpush3.bf16.msra.mxu0 %v1690_v0  ;;  %1684 = vmatpush3.bf16.msra.mxu1 %v1690_v0  ;;  %v1693_v5 = vld [vmem:[%s2061_s0 + $0x80] sm:$0xff]   ;;  %v360_v7 = vand.u32 %v1691_v1, %v358_v6  ;;  %v1695_v9 = vld [vmem:[%s2061_s0 + $0x88] sm:$0xff]   ;;  %v1698_v12 = vld [vmem:[%s2061_s0 + $0x18] sm:$0xff]  }
   0x4   :  { %1618 = vmatprep.mubr.msk.bf16.mxu0 %vm258_vm2, %v1692_v4  ;;  %1650 = vmatprep.mubr.msk.bf16.mxu1 %vm258_vm2, %v1693_v5  ;;  %v1699_v13 = vld [vmem:[%s2061_s0 + $0x98] sm:$0xff]   ;;  %v1700_v14 = vld [vmem:[%s2061_s0 + $0x20] sm:$0xff]   ;;  %v1702_v16 = vld [vmem:[%s2061_s0 + $0x28] sm:$0xff]  }
   0x5   :  { %1616 = vmatprep.subr.bf16.mxu0 %v360_v7  ;;  %1683 = vmatprep.subr.bf16.mxu1 %v360_v7  ;;  %v1701_v15 = vld [vmem:[%s2061_s0 + $0xa0] sm:$0xff]   ;;  %v1703_v17 = vld [vmem:[%s2061_s0 + $0xa8] sm:$0xff]   ;;  %v1704_v18 = vld [vmem:[%s2061_s0 + $0x30] sm:$0xff]  }
   0x6   :  { %v1705_v19 = vld [vmem:[%s2061_s0 + $0xb0] sm:$0xff]   ;;  %v1706_v20 = vld [vmem:[%s2061_s0 + $0x38] sm:$0xff]   ;;  %v1708_v22 = vld [vmem:[%s2061_s0 + $0x40] sm:$0xff]  }
   0x7   :  { %1617 = vmatpush3.bf16.msra.mxu0 %v360_v7  ;;  %1685 = vmatpush3.bf16.msra.mxu1 %v360_v7  ;;  %v1707_v21 = vld [vmem:[%s2061_s0 + $0xb8] sm:$0xff]   ;;  %v1709_v23 = vld [vmem:[%s2061_s0 + $0xc0] sm:$0xff]  }
   0xa   :  { %1619 = vmatmul.mubr.msk.bf16.vlgmr.msra.gmra.mrb[0].mxu0 %vm258_vm2, %v1694_v8  ;;  %1651 = vmatmul.mubr.msk.bf16.vlgmr.msra.gmra.mrb[0].mxu1 %vm258_vm2, %v1695_v9 }
   0xb   :  { %1622 = vmatprep.mubr.msk.bf16.mxu0 %vm258_vm2, %v1696_v10  ;;  %1654 = vmatprep.mubr.msk.bf16.mxu1 %vm258_vm2, %v1697_v11 }
  0x12   :  { %1623 = vmatmul.mubr.msk.bf16.gmra.mrb[4].mxu0 %vm258_vm2, %v1698_v12  ;;  %1655 = vmatmul.mubr.msk.bf16.gmra.mrb[4].mxu1 %vm258_vm2, %v1699_v13 }
  0x13   :  { %1626 = vmatprep.mubr.msk.bf16.mxu0 %vm258_vm2, %v1700_v14  ;;  %1658 = vmatprep.mubr.msk.bf16.mxu1 %vm258_vm2, %v1701_v15 }
  0x1a   :  { %1627 = vmatmul.mubr.msk.bf16.gmra.mrb[8].mxu0 %vm258_vm2, %v1702_v16  ;;  %1659 = vmatmul.mubr.msk.bf16.gmra.mrb[8].mxu1 %vm258_vm2, %v1703_v17 }
  0x1b   :  { %1630 = vmatprep.mubr.msk.bf16.mxu0 %vm258_vm2, %v1704_v18  ;;  %1662 = vmatprep.mubr.msk.bf16.mxu1 %vm258_vm2, %v1705_v19 }
  0x1c   :  { %9 = vsyncpa [#allocation3], 0  ;;  %v1710_v24 = vld [vmem:[%s2061_s0 + $0x48] sm:$0xff]   ;;  %v1712_v26 = vld [vmem:[%s2061_s0 + $0x50] sm:$0xff]  }
  0x1d   :  { %v1711_v25 = vld [vmem:[%s2061_s0 + $0xc8] sm:$0xff]   ;;  %v1713_v27 = vld [vmem:[%s2061_s0 + $0xd0] sm:$0xff]   ;;  %v1714_v28 = vld [vmem:[%s2061_s0 + $0x58] sm:$0xff]  }
  0x1e   :  { %v1715_v29 = vld [vmem:[%s2061_s0 + $0xd8] sm:$0xff]   ;;  %v1716_v30 = vld [vmem:[%s2061_s0 + $0x60] sm:$0xff]   ;;  %v1718_v32 = vld [vmem:[%s2061_s0 + $0x68] sm:$0xff]  }
  0x1f   :  { %v1717_v31 = vld [vmem:[%s2061_s0 + $0xe0] sm:$0xff]   ;;  %v1719_v33 = vld [vmem:[%s2061_s0 + $0xe8] sm:$0xff]   ;;  %v1720_v34 = vld [vmem:[%s2061_s0 + $0x70] sm:$0xff]  }
  0x20   :  { %v1721_v35 = vld [vmem:[%s2061_s0 + $0xf0] sm:$0xff]   ;;  %v1722_v36 = vld [vmem:[%s2061_s0 + $0x78] sm:$0xff]   ;;  %v1914_v38 = vld [vmem:[%s2063_s2] ss:$0 sm:$0xff] }
  0x21   :  { %v1723_v37 = vld [vmem:[%s2061_s0 + $0xf8] sm:$0xff]   ;;  %v1919_v40 = vld [vmem:[%s2064_s3] ss:$0 sm:$0xff]  ;;  %s1749_s0 = smov [#allocation2]  }
  0x22   :  { %1631 = vmatmul.mubr.msk.bf16.gmra.mrb[12].mxu0 %vm258_vm2, %v1706_v20  ;;  %1663 = vmatmul.mubr.msk.bf16.gmra.mrb[12].mxu1 %vm258_vm2, %v1707_v21  ;;  %s1182_s2 = sshll.u32 %s1749_s0, 4  ;;  %s1183_s2 = int_to_ptr.vmem [resolvable:$true] %s1182_s2 }
  0x23   :  { %1634 = vmatprep.mubr.msk.bf16.mxu0 %vm258_vm2, %v1708_v22  ;;  %1666 = vmatprep.mubr.msk.bf16.mxu1 %vm258_vm2, %v1709_v23  ;;  %s1724_s3 = scalar_lea.vmem %s1183_s2, 4096  ;;  %p1729_p1 = scmp.lt.s32.totalorder %s1183_s2, %s1183_s2 }
  0x24   :  { %p1725_p0 = scmp.ne.s32.totalorder %s1183_s2, %s1724_s3  ;;  %p1730_p2 = scmp.lt.s32.totalorder %s1724_s3, %s1724_s3 }
  0x26   :  { %p1731_p3 = por %p1730_p2, %p1729_p1 }
  0x28   :  { %p1732_p4 = pnand %p1731_p3, %p1725_p0 }
  0x2a   :  { %1635 = vmatmul.mubr.msk.bf16.gmra.mrb[16].mxu0 %vm258_vm2, %v1710_v24  ;;  %1667 = vmatmul.mubr.msk.bf16.gmra.mrb[16].mxu1 %vm258_vm2, %v1711_v25 }
  0x2b   :  { %1638 = vmatprep.mubr.msk.bf16.mxu0 %vm258_vm2, %v1712_v26  ;;  %1670 = vmatprep.mubr.msk.bf16.mxu1 %vm258_vm2, %v1713_v27 }
  0x32   :  { %1639 = vmatmul.mubr.msk.bf16.gmra.mrb[20].mxu0 %vm258_vm2, %v1714_v28  ;;  %1671 = vmatmul.mubr.msk.bf16.gmra.mrb[20].mxu1 %vm258_vm2, %v1715_v29 }
  0x33   :  { %1642 = vmatprep.mubr.msk.bf16.mxu0 %vm258_vm2, %v1716_v30  ;;  %1674 = vmatprep.mubr.msk.bf16.mxu1 %vm258_vm2, %v1717_v31 }
  0x3a   :  { %1643 = vmatmul.mubr.msk.bf16.gmra.mrb[24].mxu0 %vm258_vm2, %v1718_v32  ;;  %1675 = vmatmul.mubr.msk.bf16.gmra.mrb[24].mxu1 %vm258_vm2, %v1719_v33 }
  0x3b   :  { %1646 = vmatprep.mubr.msk.bf16.mxu0 %vm258_vm2, %v1720_v34  ;;  %1678 = vmatprep.mubr.msk.bf16.mxu1 %vm258_vm2, %v1721_v35 }
  0x42   :  { %1647 = vmatmul.mubr.msk.bf16.gmra.mrb[28].mxu0 %vm258_vm2, %v1722_v36  ;;  %1679 = vmatmul.mubr.msk.bf16.gmra.mrb[28].mxu1 %vm258_vm2, %v1723_v37 }
  0xdd   :  { %v1620_v39 = vpop.f32.mrb[0].mxu0  ;;  %v1652_v41 = vpop.f32.mrb[0].mxu1 }
  0xde   :  { %v660_v42 = vmul.f32 %v1620_v39, %v1914_v38  ;;  %v692_v43 = vmul.f32 %v1652_v41, %v1914_v38  ;;  %v396_v44 = vpop.f32.mrb[1].mxu0  ;;  %v524_v45 = vpop.f32.mrb[1].mxu1 }
  0xdf   :  { %v658_v46 = vmul.f32 %v1914_v38, %v396_v44  ;;  %v690_v47 = vmul.f32 %v1914_v38, %v524_v45  ;;  %v1621_v48 = vpop.f32.mrb[2].mxu0  ;;  %v1653_v49 = vpop.f32.mrb[2].mxu1 }
  0xe0   :  { %v731_v50 = vadd.f32 %v1919_v40, %v660_v42  ;;  %v763_v51 = vadd.f32 %v1919_v40, %v692_v43  ;;  %v661_v52 = vmul.f32 %v1621_v48, %v1914_v38  ;;  %v693_v53 = vmul.f32 %v1653_v49, %v1914_v38  ;;  %v399_v54 = vpop.f32.mrb[3].mxu0  ;;  %v527_v55 = vpop.f32.mrb[3].mxu1 }
  0xe1   :  { %v729_v56 = vadd.f32 %v1919_v40, %v658_v46  ;;  %v761_v57 = vadd.f32 %v1919_v40, %v690_v47  ;;  %v659_v58 = vmul.f32 %v1914_v38, %v399_v54  ;;  %v691_v59 = vmul.f32 %v1914_v38, %v527_v55 }
  0xe2   :  { %v732_v60 = vadd.f32 %v1919_v40, %v661_v52  ;;  %v764_v61 = vadd.f32 %v1919_v40, %v693_v53  ;;  %v795_v0 = vmax.f32 %v731_v50, 0.0  ;;  %v827_v1 = vmax.f32 %v763_v51, 0.0 }
  0xe3   :  { %v730_v62 = vadd.f32 %v1919_v40, %v659_v58  ;;  %v762_v63 = vadd.f32 %v1919_v40, %v691_v59  ;;  %v793_v4 = vmax.f32 %v729_v56, 0.0  ;;  %v825_v5 = vmax.f32 %v761_v57, 0.0 }
  0xe4   :  { %v796_v2 = vmax.f32 %v732_v60, 0.0  ;;  %v828_v3 = vmax.f32 %v764_v61, 0.0 }
  0xe5   :  { %v794_v6 = vmax.f32 %v730_v62, 0.0  ;;  %v826_v7 = vmax.f32 %v762_v63, 0.0  ;;  %v1624_v8 = vpop.f32.mrb[4].mxu0  ;;  %v1656_v9 = vpop.f32.mrb[4].mxu1 }
  0xe6   :  { %v1397_v10 = vpack.c.bf16 %v796_v2, %v795_v0  ;;  %v1477_v11 = vpack.c.bf16 %v828_v3, %v827_v1  ;;  %v664_v12 = vmul.f32 %v1624_v8, %v1914_v38  ;;  %v696_v13 = vmul.f32 %v1656_v9, %v1914_v38  ;;  %v412_v14 = vpop.f32.mrb[5].mxu0  ;;  %v540_v15 = vpop.f32.mrb[5].mxu1 }
  0xe7   :  { %v1392_v16 = vpack.c.bf16 %v794_v6, %v793_v4  ;;  %v1472_v17 = vpack.c.bf16 %v826_v7, %v825_v5  ;;  %v662_v18 = vmul.f32 %v1914_v38, %v412_v14  ;;  %v694_v19 = vmul.f32 %v1914_v38, %v540_v15  ;;  %v1625_v20 = vpop.f32.mrb[6].mxu0  ;;  %v1657_v21 = vpop.f32.mrb[6].mxu1 }
  0xe8   :  { %1549 = vst [vmem:[#allocation2 + $0x8] sm:$0xff] %v1397_v10   ;;  %1565 = vst [vmem:[#allocation2 + $0x88] sm:$0xff] %v1477_v11   ;;  %v735_v22 = vadd.f32 %v1919_v40, %v664_v12  ;;  %v767_v23 = vadd.f32 %v1919_v40, %v696_v13  ;;  %v665_v24 = vmul.f32 %v1625_v20, %v1914_v38  ;;  %v415_v26 = vpop.f32.mrb[7].mxu0  ;;  %v543_v27 = vpop.f32.mrb[7].mxu1 }
  0xe9   :  { %v697_v25 = vmul.f32 %v1657_v21, %v1914_v38  ;;  %1393 = vst [vmem:[#allocation2] sm:$0xff] %v1392_v16   ;;  %1564 = vst [vmem:[#allocation2 + $0x80] sm:$0xff] %v1472_v17   ;;  %v733_v28 = vadd.f32 %v1919_v40, %v662_v18  ;;  %v765_v29 = vadd.f32 %v1919_v40, %v694_v19 }
  0xea   :  { %v663_v30 = vmul.f32 %v1914_v38, %v415_v26  ;;  %v695_v31 = vmul.f32 %v1914_v38, %v543_v27  ;;  %v736_v32 = vadd.f32 %v1919_v40, %v665_v24  ;;  %v799_v36 = vmax.f32 %v735_v22, 0.0 }
  0xeb   :  { %v768_v33 = vadd.f32 %v1919_v40, %v697_v25  ;;  %v831_v37 = vmax.f32 %v767_v23, 0.0  ;;  %v797_v42 = vmax.f32 %v733_v28, 0.0  ;;  %v829_v43 = vmax.f32 %v765_v29, 0.0 }
  0xec   :  { %v734_v34 = vadd.f32 %v1919_v40, %v663_v30  ;;  %v766_v35 = vadd.f32 %v1919_v40, %v695_v31  ;;  %v800_v39 = vmax.f32 %v736_v32, 0.0 }
  0xed   :  { %v832_v41 = vmax.f32 %v768_v33, 0.0  ;;  %v1628_v46 = vpop.f32.mrb[8].mxu0  ;;  %v1660_v47 = vpop.f32.mrb[8].mxu1 }
  0xee   :  { %v798_v44 = vmax.f32 %v734_v34, 0.0  ;;  %v830_v45 = vmax.f32 %v766_v35, 0.0  ;;  %v1407_v48 = vpack.c.bf16 %v800_v39, %v799_v36  ;;  %v668_v50 = vmul.f32 %v1628_v46, %v1914_v38  ;;  %v428_v52 = vpop.f32.mrb[9].mxu0  ;;  %v556_v53 = vpop.f32.mrb[9].mxu1 }
  0xef   :  { %v1487_v49 = vpack.c.bf16 %v832_v41, %v831_v37  ;;  %v700_v51 = vmul.f32 %v1660_v47, %v1914_v38  ;;  %v666_v56 = vmul.f32 %v1914_v38, %v428_v52  ;;  %v698_v57 = vmul.f32 %v1914_v38, %v556_v53  ;;  %v1629_v58 = vpop.f32.mrb[10].mxu0  ;;  %v1661_v59 = vpop.f32.mrb[10].mxu1 }
  0xf0   :  { %v1402_v54 = vpack.c.bf16 %v798_v44, %v797_v42  ;;  %v1482_v55 = vpack.c.bf16 %v830_v45, %v829_v43  ;;  %1551 = vst [vmem:[#allocation2 + $0x18] sm:$0xff] %v1407_v48   ;;  %v739_v60 = vadd.f32 %v1919_v40, %v668_v50  ;;  %v669_v62 = vmul.f32 %v1629_v58, %v1914_v38  ;;  %v431_v0 = vpop.f32.mrb[11].mxu0  ;;  %v559_v1 = vpop.f32.mrb[11].mxu1 }
  0xf1   :  { %1567 = vst [vmem:[#allocation2 + $0x98] sm:$0xff] %v1487_v49   ;;  %v771_v61 = vadd.f32 %v1919_v40, %v700_v51  ;;  %v701_v63 = vmul.f32 %v1661_v59, %v1914_v38  ;;  %v737_v2 = vadd.f32 %v1919_v40, %v666_v56  ;;  %v769_v3 = vadd.f32 %v1919_v40, %v698_v57 }
  0xf2   :  { %1550 = vst [vmem:[#allocation2 + $0x10] sm:$0xff] %v1402_v54   ;;  %1566 = vst [vmem:[#allocation2 + $0x90] sm:$0xff] %v1482_v55   ;;  %v667_v4 = vmul.f32 %v1914_v38, %v431_v0  ;;  %v699_v5 = vmul.f32 %v1914_v38, %v559_v1  ;;  %v740_v6 = vadd.f32 %v1919_v40, %v669_v62  ;;  %v803_v10 = vmax.f32 %v739_v60, 0.0 }
  0xf3   :  { %v772_v7 = vadd.f32 %v1919_v40, %v701_v63  ;;  %v835_v11 = vmax.f32 %v771_v61, 0.0  ;;  %v801_v14 = vmax.f32 %v737_v2, 0.0  ;;  %v833_v15 = vmax.f32 %v769_v3, 0.0 }
  0xf4   :  { %v738_v8 = vadd.f32 %v1919_v40, %v667_v4  ;;  %v770_v9 = vadd.f32 %v1919_v40, %v699_v5  ;;  %v804_v12 = vmax.f32 %v740_v6, 0.0 }
  0xf5   :  { %v836_v13 = vmax.f32 %v772_v7, 0.0  ;;  %v1632_v18 = vpop.f32.mrb[12].mxu0  ;;  %v1664_v19 = vpop.f32.mrb[12].mxu1 }
  0xf6   :  { %v802_v16 = vmax.f32 %v738_v8, 0.0  ;;  %v834_v17 = vmax.f32 %v770_v9, 0.0  ;;  %v1417_v20 = vpack.c.bf16 %v804_v12, %v803_v10  ;;  %v672_v22 = vmul.f32 %v1632_v18, %v1914_v38  ;;  %v444_v24 = vpop.f32.mrb[13].mxu0  ;;  %v572_v25 = vpop.f32.mrb[13].mxu1 }
  0xf7   :  { %v1497_v21 = vpack.c.bf16 %v836_v13, %v835_v11  ;;  %v704_v23 = vmul.f32 %v1664_v19, %v1914_v38  ;;  %v670_v28 = vmul.f32 %v1914_v38, %v444_v24  ;;  %v702_v29 = vmul.f32 %v1914_v38, %v572_v25  ;;  %v1633_v30 = vpop.f32.mrb[14].mxu0  ;;  %v1665_v31 = vpop.f32.mrb[14].mxu1 }
  0xf8   :  { %v1412_v26 = vpack.c.bf16 %v802_v16, %v801_v14  ;;  %v1492_v27 = vpack.c.bf16 %v834_v17, %v833_v15  ;;  %1553 = vst [vmem:[#allocation2 + $0x28] sm:$0xff] %v1417_v20   ;;  %v743_v32 = vadd.f32 %v1919_v40, %v672_v22  ;;  %v673_v34 = vmul.f32 %v1633_v30, %v1914_v38  ;;  %v447_v36 = vpop.f32.mrb[15].mxu0  ;;  %v575_v37 = vpop.f32.mrb[15].mxu1 }
  0xf9   :  { %1569 = vst [vmem:[#allocation2 + $0xa8] sm:$0xff] %v1497_v21   ;;  %v775_v33 = vadd.f32 %v1919_v40, %v704_v23  ;;  %v705_v35 = vmul.f32 %v1665_v31, %v1914_v38  ;;  %v741_v39 = vadd.f32 %v1919_v40, %v670_v28  ;;  %v773_v41 = vadd.f32 %v1919_v40, %v702_v29 }
  0xfa   :  { %1552 = vst [vmem:[#allocation2 + $0x20] sm:$0xff] %v1412_v26   ;;  %1568 = vst [vmem:[#allocation2 + $0xa0] sm:$0xff] %v1492_v27   ;;  %v671_v42 = vmul.f32 %v1914_v38, %v447_v36  ;;  %v703_v43 = vmul.f32 %v1914_v38, %v575_v37  ;;  %v744_v44 = vadd.f32 %v1919_v40, %v673_v34  ;;  %v807_v48 = vmax.f32 %v743_v32, 0.0 }
  0xfb   :  { %v776_v45 = vadd.f32 %v1919_v40, %v705_v35  ;;  %v839_v49 = vmax.f32 %v775_v33, 0.0  ;;  %v805_v52 = vmax.f32 %v741_v39, 0.0  ;;  %v837_v53 = vmax.f32 %v773_v41, 0.0 }
  0xfc   :  { %v742_v46 = vadd.f32 %v1919_v40, %v671_v42  ;;  %v774_v47 = vadd.f32 %v1919_v40, %v703_v43  ;;  %v808_v50 = vmax.f32 %v744_v44, 0.0 }
  0xfd   :  { %v840_v51 = vmax.f32 %v776_v45, 0.0  ;;  %v1636_v56 = vpop.f32.mrb[16].mxu0  ;;  %v1668_v57 = vpop.f32.mrb[16].mxu1 }
  0xfe   :  { %v806_v54 = vmax.f32 %v742_v46, 0.0  ;;  %v838_v55 = vmax.f32 %v774_v47, 0.0  ;;  %v1427_v58 = vpack.c.bf16 %v808_v50, %v807_v48  ;;  %v676_v60 = vmul.f32 %v1636_v56, %v1914_v38  ;;  %v460_v62 = vpop.f32.mrb[17].mxu0  ;;  %v588_v63 = vpop.f32.mrb[17].mxu1 }
  0xff   :  { %v1507_v59 = vpack.c.bf16 %v840_v51, %v839_v49  ;;  %v708_v61 = vmul.f32 %v1668_v57, %v1914_v38  ;;  %v674_v2 = vmul.f32 %v1914_v38, %v460_v62  ;;  %v706_v3 = vmul.f32 %v1914_v38, %v588_v63  ;;  %v1637_v4 = vpop.f32.mrb[18].mxu0  ;;  %v1669_v5 = vpop.f32.mrb[18].mxu1 }
 0x100   :  { %v1422_v0 = vpack.c.bf16 %v806_v54, %v805_v52  ;;  %v1502_v1 = vpack.c.bf16 %v838_v55, %v837_v53  ;;  %1555 = vst [vmem:[#allocation2 + $0x38] sm:$0xff] %v1427_v58   ;;  %v747_v6 = vadd.f32 %v1919_v40, %v676_v60  ;;  %v677_v8 = vmul.f32 %v1637_v4, %v1914_v38  ;;  %v463_v10 = vpop.f32.mrb[19].mxu0  ;;  %v591_v11 = vpop.f32.mrb[19].mxu1 }
 0x101   :  { %1571 = vst [vmem:[#allocation2 + $0xb8] sm:$0xff] %v1507_v59   ;;  %v779_v7 = vadd.f32 %v1919_v40, %v708_v61  ;;  %v709_v9 = vmul.f32 %v1669_v5, %v1914_v38  ;;  %v745_v12 = vadd.f32 %v1919_v40, %v674_v2  ;;  %v777_v13 = vadd.f32 %v1919_v40, %v706_v3 }
 0x102   :  { %1554 = vst [vmem:[#allocation2 + $0x30] sm:$0xff] %v1422_v0   ;;  %1570 = vst [vmem:[#allocation2 + $0xb0] sm:$0xff] %v1502_v1   ;;  %v675_v14 = vmul.f32 %v1914_v38, %v463_v10  ;;  %v707_v15 = vmul.f32 %v1914_v38, %v591_v11  ;;  %v748_v16 = vadd.f32 %v1919_v40, %v677_v8  ;;  %v811_v20 = vmax.f32 %v747_v6, 0.0 }
 0x103   :  { %v780_v17 = vadd.f32 %v1919_v40, %v709_v9  ;;  %v843_v21 = vmax.f32 %v779_v7, 0.0  ;;  %v809_v24 = vmax.f32 %v745_v12, 0.0  ;;  %v841_v25 = vmax.f32 %v777_v13, 0.0 }
 0x104   :  { %v746_v18 = vadd.f32 %v1919_v40, %v675_v14  ;;  %v778_v19 = vadd.f32 %v1919_v40, %v707_v15  ;;  %v812_v22 = vmax.f32 %v748_v16, 0.0 }
 0x105   :  { %v844_v23 = vmax.f32 %v780_v17, 0.0  ;;  %v1640_v28 = vpop.f32.mrb[20].mxu0  ;;  %v1672_v29 = vpop.f32.mrb[20].mxu1 }
 0x106   :  { %v810_v26 = vmax.f32 %v746_v18, 0.0  ;;  %v842_v27 = vmax.f32 %v778_v19, 0.0  ;;  %v1437_v30 = vpack.c.bf16 %v812_v22, %v811_v20  ;;  %v680_v32 = vmul.f32 %v1640_v28, %v1914_v38  ;;  %v476_v34 = vpop.f32.mrb[21].mxu0  ;;  %v604_v35 = vpop.f32.mrb[21].mxu1 }
 0x107   :  { %v1517_v31 = vpack.c.bf16 %v844_v23, %v843_v21  ;;  %v712_v33 = vmul.f32 %v1672_v29, %v1914_v38  ;;  %v678_v39 = vmul.f32 %v1914_v38, %v476_v34  ;;  %v710_v41 = vmul.f32 %v1914_v38, %v604_v35  ;;  %v1641_v42 = vpop.f32.mrb[22].mxu0  ;;  %v1673_v43 = vpop.f32.mrb[22].mxu1 }
 0x108   :  { %v1432_v36 = vpack.c.bf16 %v810_v26, %v809_v24  ;;  %v1512_v37 = vpack.c.bf16 %v842_v27, %v841_v25  ;;  %1557 = vst [vmem:[#allocation2 + $0x48] sm:$0xff] %v1437_v30   ;;  %v751_v44 = vadd.f32 %v1919_v40, %v680_v32  ;;  %v681_v46 = vmul.f32 %v1641_v42, %v1914_v38  ;;  %v479_v48 = vpop.f32.mrb[23].mxu0  ;;  %v607_v49 = vpop.f32.mrb[23].mxu1 }
 0x109   :  { %1573 = vst [vmem:[#allocation2 + $0xc8] sm:$0xff] %v1517_v31   ;;  %v783_v45 = vadd.f32 %v1919_v40, %v712_v33  ;;  %v713_v47 = vmul.f32 %v1673_v43, %v1914_v38  ;;  %v749_v50 = vadd.f32 %v1919_v40, %v678_v39  ;;  %v781_v51 = vadd.f32 %v1919_v40, %v710_v41 }
 0x10a   :  { %1556 = vst [vmem:[#allocation2 + $0x40] sm:$0xff] %v1432_v36   ;;  %1572 = vst [vmem:[#allocation2 + $0xc0] sm:$0xff] %v1512_v37   ;;  %v679_v52 = vmul.f32 %v1914_v38, %v479_v48  ;;  %v711_v53 = vmul.f32 %v1914_v38, %v607_v49  ;;  %v752_v54 = vadd.f32 %v1919_v40, %v681_v46  ;;  %v815_v58 = vmax.f32 %v751_v44, 0.0 }
 0x10b   :  { %v784_v55 = vadd.f32 %v1919_v40, %v713_v47  ;;  %v847_v59 = vmax.f32 %v783_v45, 0.0  ;;  %v813_v62 = vmax.f32 %v749_v50, 0.0  ;;  %v845_v63 = vmax.f32 %v781_v51, 0.0 }
 0x10c   :  { %v750_v56 = vadd.f32 %v1919_v40, %v679_v52  ;;  %v782_v57 = vadd.f32 %v1919_v40, %v711_v53  ;;  %v816_v60 = vmax.f32 %v752_v54, 0.0 }
 0x10d   :  { %v848_v61 = vmax.f32 %v784_v55, 0.0  ;;  %v1644_v2 = vpop.f32.mrb[24].mxu0  ;;  %v1676_v3 = vpop.f32.mrb[24].mxu1 }
 0x10e   :  { %v814_v0 = vmax.f32 %v750_v56, 0.0  ;;  %v846_v1 = vmax.f32 %v782_v57, 0.0  ;;  %v1447_v4 = vpack.c.bf16 %v816_v60, %v815_v58  ;;  %v684_v6 = vmul.f32 %v1644_v2, %v1914_v38  ;;  %v492_v8 = vpop.f32.mrb[25].mxu0  ;;  %v620_v9 = vpop.f32.mrb[25].mxu1 }
 0x10f   :  { %v1527_v5 = vpack.c.bf16 %v848_v61, %v847_v59  ;;  %v716_v7 = vmul.f32 %v1676_v3, %v1914_v38  ;;  %v682_v12 = vmul.f32 %v1914_v38, %v492_v8  ;;  %v714_v13 = vmul.f32 %v1914_v38, %v620_v9  ;;  %v1645_v14 = vpop.f32.mrb[26].mxu0  ;;  %v1677_v15 = vpop.f32.mrb[26].mxu1 }
 0x110   :  { %v1442_v10 = vpack.c.bf16 %v814_v0, %v813_v62  ;;  %v1522_v11 = vpack.c.bf16 %v846_v1, %v845_v63  ;;  %1559 = vst [vmem:[#allocation2 + $0x58] sm:$0xff] %v1447_v4   ;;  %v755_v16 = vadd.f32 %v1919_v40, %v684_v6  ;;  %v685_v18 = vmul.f32 %v1645_v14, %v1914_v38  ;;  %v495_v20 = vpop.f32.mrb[27].mxu0  ;;  %v623_v21 = vpop.f32.mrb[27].mxu1 }
 0x111   :  { %1575 = vst [vmem:[#allocation2 + $0xd8] sm:$0xff] %v1527_v5   ;;  %v787_v17 = vadd.f32 %v1919_v40, %v716_v7  ;;  %v717_v19 = vmul.f32 %v1677_v15, %v1914_v38  ;;  %v753_v22 = vadd.f32 %v1919_v40, %v682_v12  ;;  %v785_v23 = vadd.f32 %v1919_v40, %v714_v13 }
 0x112   :  { %1558 = vst [vmem:[#allocation2 + $0x50] sm:$0xff] %v1442_v10   ;;  %1574 = vst [vmem:[#allocation2 + $0xd0] sm:$0xff] %v1522_v11   ;;  %v683_v24 = vmul.f32 %v1914_v38, %v495_v20  ;;  %v715_v25 = vmul.f32 %v1914_v38, %v623_v21  ;;  %v756_v26 = vadd.f32 %v1919_v40, %v685_v18  ;;  %v819_v30 = vmax.f32 %v755_v16, 0.0 }
 0x113   :  { %v788_v27 = vadd.f32 %v1919_v40, %v717_v19  ;;  %v851_v31 = vmax.f32 %v787_v17, 0.0  ;;  %v817_v34 = vmax.f32 %v753_v22, 0.0  ;;  %v849_v35 = vmax.f32 %v785_v23, 0.0 }
 0x114   :  { %v754_v28 = vadd.f32 %v1919_v40, %v683_v24  ;;  %v786_v29 = vadd.f32 %v1919_v40, %v715_v25  ;;  %v820_v32 = vmax.f32 %v756_v26, 0.0 }
 0x115   :  { %v852_v33 = vmax.f32 %v788_v27, 0.0  ;;  %v1648_v39 = vpop.f32.mrb[28].mxu0  ;;  %v1680_v41 = vpop.f32.mrb[28].mxu1 }
 0x116   :  { %v818_v36 = vmax.f32 %v754_v28, 0.0  ;;  %v850_v37 = vmax.f32 %v786_v29, 0.0  ;;  %v1457_v42 = vpack.c.bf16 %v820_v32, %v819_v30  ;;  %v688_v44 = vmul.f32 %v1648_v39, %v1914_v38  ;;  %v508_v46 = vpop.f32.mrb[29].mxu0  ;;  %v636_v47 = vpop.f32.mrb[29].mxu1 }
 0x117   :  { %v1537_v43 = vpack.c.bf16 %v852_v33, %v851_v31  ;;  %v720_v45 = vmul.f32 %v1680_v41, %v1914_v38  ;;  %v686_v50 = vmul.f32 %v1914_v38, %v508_v46  ;;  %v718_v51 = vmul.f32 %v1914_v38, %v636_v47  ;;  %v1649_v52 = vpop.f32.mrb[30].mxu0  ;;  %v1681_v53 = vpop.f32.mrb[30].mxu1 }
 0x118   :  { %v1452_v48 = vpack.c.bf16 %v818_v36, %v817_v34  ;;  %v1532_v49 = vpack.c.bf16 %v850_v37, %v849_v35  ;;  %1561 = vst [vmem:[#allocation2 + $0x68] sm:$0xff] %v1457_v42   ;;  %v759_v54 = vadd.f32 %v1919_v40, %v688_v44  ;;  %v689_v56 = vmul.f32 %v1649_v52, %v1914_v38  ;;  %v511_v58 = vpop.f32.mrb[31].mxu0  ;;  %v639_v59 = vpop.f32.mrb[31].mxu1 }
 0x119   :  { %1577 = vst [vmem:[#allocation2 + $0xe8] sm:$0xff] %v1537_v43   ;;  %v791_v55 = vadd.f32 %v1919_v40, %v720_v45  ;;  %v721_v57 = vmul.f32 %v1681_v53, %v1914_v38  ;;  %v757_v60 = vadd.f32 %v1919_v40, %v686_v50  ;;  %v789_v61 = vadd.f32 %v1919_v40, %v718_v51 }
 0x11a   :  { %1560 = vst [vmem:[#allocation2 + $0x60] sm:$0xff] %v1452_v48   ;;  %1576 = vst [vmem:[#allocation2 + $0xe0] sm:$0xff] %v1532_v49   ;;  %v687_v62 = vmul.f32 %v1914_v38, %v511_v58  ;;  %v719_v63 = vmul.f32 %v1914_v38, %v639_v59  ;;  %v760_v0 = vadd.f32 %v1919_v40, %v689_v56  ;;  %v823_v4 = vmax.f32 %v759_v54, 0.0 }
 0x11b   :  { %v792_v1 = vadd.f32 %v1919_v40, %v721_v57  ;;  %v855_v5 = vmax.f32 %v791_v55, 0.0  ;;  %v821_v8 = vmax.f32 %v757_v60, 0.0  ;;  %v853_v9 = vmax.f32 %v789_v61, 0.0 }
 0x11c   :  { %v758_v2 = vadd.f32 %v1919_v40, %v687_v62  ;;  %v790_v3 = vadd.f32 %v1919_v40, %v719_v63  ;;  %v824_v6 = vmax.f32 %v760_v0, 0.0 }
 0x11d   :  { %v856_v7 = vmax.f32 %v792_v1, 0.0 }
 0x11e   :  { %v822_v10 = vmax.f32 %v758_v2, 0.0  ;;  %v854_v11 = vmax.f32 %v790_v3, 0.0  ;;  %v1467_v12 = vpack.c.bf16 %v824_v6, %v823_v4 }
 0x11f   :  { %v1547_v38 = vpack.c.bf16 %v856_v7, %v855_v5 }
 0x120   :  { %v1462_v13 = vpack.c.bf16 %v822_v10, %v821_v8  ;;  %v1542_v14 = vpack.c.bf16 %v854_v11, %v853_v9  ;;  %1563 = vst [vmem:[#allocation2 + $0x78] sm:$0xff] %v1467_v12  }
 0x121   :  { %1579 = vst [vmem:[#allocation2 + $0xf8] sm:$0xff] %v1547_v38  }
 0x122   :  { %1562 = vst [vmem:[#allocation2 + $0x70] sm:$0xff] %v1462_v13   ;;  %1578 = vst [vmem:[#allocation2 + $0xf0] sm:$0xff] %v1542_v14  }
 0x123   :  { %1735 = shalt.err (!%p1732_p4)
}
 0x124   :  { %s1736_s8 = scalar_lea.hbm %s2065_s4, 4096 }
 0x125   :  { %p1737_p5 = scmp.ne.s32.totalorder %s2065_s4, %s1736_s8  ;;  %p1740_p6 = scmp.lt.u32.totalorder %s1736_s8, %s2065_s4 }
 0x127   :  { %p1742_p7 = pnand %p1740_p6, %p1737_p5 }
 0x129   :  { %1745 = shalt.err (!%p1742_p7)
}
 0x12a   :  { %s1750_s13 = smov 64   ;;  %s1751_s14 = smov 4  }
 0x12b   :  { %1188 = dma.vmem_to_hbm [thread:$0]  %s1183_s2, 4096, %s2065_s4, [#allocation3], %s1750_s13, %s1750_s13, %s1751_s14  }
 0x12c   :  { %1746 = dma.done.wait [#allocation3], 4096  }
 0x12d   :  { %1747 = vsyncadd [#allocation3], 4294963200 }
 0x12e   :  { %1192 = vsyncpa [#allocation3], 1 }

</bundles_post_ra>
